<compile_context>
chip_gen: v6e
topology: v6e:2x2x1
jax: 0.10.0
libtpu: 0.0.40
codegen_flags: <defaults>
</compile_context>

<pallas_src>
import functools

import jax
import jax.numpy as jnp
from jax import lax
from jax.experimental import pallas as pl
from jax.experimental.pallas import tpu as pltpu

VOCAB = 100    # input_size  (synthetic vocab)
EMBED = 300    # embed_size  (GloVe-style 300-d)
BATCH = 2
SEQ = 8

ROWS_PER_BLOCK = 8  # one sublane-dense output tile per grid step


def awe_kernel(tok_ref, table_ref, out_ref, *, seq_len, vocab, inv_t,
               rows_per_block):
    """One grid step == one block of `rows_per_block` batch rows.

    tok_ref   : [B_pad, T] int32 in SMEM (scalar prefetch)
    table_ref : [V, 1, E_pad] f32 in VMEM (whole table, resident; one bulk DMA)
    out_ref   : [rows_per_block, E_pad] f32 in VMEM
    """
    bblk = pl.program_id(0)

    for r in range(rows_per_block):  # static unroll over the 8 sublane rows
        b = bblk * rows_per_block + r

        def gather(t):
            tok = tok_ref[b, t]
            tok = jnp.minimum(jnp.maximum(tok, 0), vocab - 1)  # clamp OOB ids
            return table_ref[tok]  # (1, E_pad) dynamic row load from VMEM

        # First step writes directly (no zero-init + add), then accumulate.
        acc0 = gather(0)
        acc = lax.fori_loop(1, seq_len, lambda t, a: a + gather(t), acc0)
        out_ref[r:r + 1, :] = acc * inv_t


def pad_embedding_table(emb_table):
    """One-time (init-time) layout prep: lane-pad E and add a unit middle axis.

    Hoisted out of the forward path so per-call cost is independent of V.
    """
    V, E = emb_table.shape
    e_pad = ((E + 127) // 128) * 128
    if e_pad != E:
        emb_table = jnp.pad(emb_table, ((0, 0), (0, e_pad - E)))
    return emb_table.reshape(V, 1, e_pad)


@functools.partial(jax.jit, static_argnames=("embed_size",))
def awe_forward(tokens, emb3, *, embed_size):
    """tokens: [B, T] int32; emb3: [V, 1, E_pad] f32 (pre-padded) -> [B, E]."""
    B, T = tokens.shape
    V, _, e_pad = emb3.shape

    # Pad batch up to a multiple of 8 so each output block is sublane-dense.
    b_pad = ((B + ROWS_PER_BLOCK - 1) // ROWS_PER_BLOCK) * ROWS_PER_BLOCK
    if b_pad != B:
        tokens = jnp.pad(tokens, ((0, b_pad - B), (0, 0)))  # pads with id 0

    out = pl.pallas_call(
        functools.partial(awe_kernel, seq_len=T, vocab=V, inv_t=1.0 / T,
                          rows_per_block=ROWS_PER_BLOCK),
        out_shape=jax.ShapeDtypeStruct((b_pad, e_pad), jnp.float32),
        grid_spec=pltpu.PrefetchScalarGridSpec(
            num_scalar_prefetch=1,
            grid=(b_pad // ROWS_PER_BLOCK,),
            in_specs=[
                # Whole table as one block; constant index_map keeps it
                # resident in VMEM across grid steps (single bulk DMA).
                pl.BlockSpec((V, 1, e_pad), lambda i, tok: (0, 0, 0)),
            ],
            out_specs=pl.BlockSpec((ROWS_PER_BLOCK, e_pad),
                                   lambda i, tok: (i, 0)),
        ),
        compiler_params=pltpu.CompilerParams(
            dimension_semantics=("parallel",)),  # batch blocks -> v7x megacore
    )(tokens, emb3)

    return out[:B, :embed_size]


if __name__ == "__main__":
    key = jax.random.PRNGKey(0)
    k_emb, k_tok = jax.random.split(key, 2)

    # nn.Embedding weight (stands in for the learned table) + token ids.
    emb_table = jax.random.normal(k_emb, (VOCAB, EMBED), jnp.float32) * 0.1
    tokens = jax.random.randint(k_tok, (BATCH, SEQ), 0, VOCAB, dtype=jnp.int32)

    # One-time layout prep (hoisted out of the forward path).
    emb3 = pad_embedding_table(emb_table)

    out = awe_forward(tokens, emb3, embed_size=EMBED)
    out = jax.block_until_ready(out)

    # Pure-JAX reference: embedding lookup + mean over the sequence axis.
    ref = jnp.mean(emb_table[tokens], axis=1)

    assert out.shape == (BATCH, EMBED)
    assert jnp.allclose(out, ref, atol=1e-5, rtol=1e-5), "mismatch vs JAX reference"

    print("KERNEL_OK")
</pallas_src>

<mosaic_0001>
module attributes {stable_mosaic.version = 11 : i64} {
  func.func @awe_kernel(%arg0: i32, %arg1: memref<8x8xi32, #tpu.memory_space<smem>>, %arg2: memref<100x1x384xf32, #tpu.memory_space<vmem>>, %arg3: memref<8x384xf32, #tpu.memory_space<vmem>>) attributes {dimension_semantics = [#tpu.dimension_semantics<parallel>], iteration_bounds = array<i64: 1>, scalar_prefetch = 1 : i64, scratch_operands = 0 : i64, tpu.core_type = #tpu.core_type<tc>, window_params = [{pipeline_mode = #tpu.pipeline_mode<synchronous>, transform_indices = @transform_0, window_bounds = array<i64: 100, 1, 384>}, {transform_indices = @transform_1, window_bounds = array<i64: 8, 384>}]} {
    %c8_i32 = arith.constant 8 : i32
    %0 = arith.muli %arg0, %c8_i32 : i32
    %c0_i32 = arith.constant 0 : i32
    %1 = arith.addi %0, %c0_i32 : i32
    %2 = arith.index_cast %1 : i32 to index
    %c0 = arith.constant 0 : index
    %3 = memref.load %arg1[%2, %c0] : memref<8x8xi32, #tpu.memory_space<smem>>
    %c0_i32_0 = arith.constant 0 : i32
    %4 = arith.maxsi %3, %c0_i32_0 : i32
    %c99_i32 = arith.constant 99 : i32
    %5 = arith.minsi %4, %c99_i32 : i32
    %6 = arith.index_cast %5 : i32 to index
    %c0_1 = arith.constant 0 : index
    %c0_2 = arith.constant 0 : index
    %7 = vector.load %arg2[%6, %c0_1, %c0_2] : memref<100x1x384xf32, #tpu.memory_space<vmem>>, vector<1x1x384xf32>
    %8 = vector.shape_cast %7 : vector<1x1x384xf32> to vector<1x384xf32>
    %c1_i32 = arith.constant 1 : i32
    %c7_i32 = arith.constant 7 : i32
    %9 = arith.addi %c1_i32, %c7_i32 : i32
    %c1_i32_3 = arith.constant 1 : i32
    %10 = scf.for %arg4 = %c1_i32 to %9 step %c1_i32_3 iter_args(%arg5 = %8) -> (vector<1x384xf32>)  : i32 {
      %112 = arith.index_cast %1 : i32 to index
      %113 = arith.index_cast %arg4 : i32 to index
      %114 = memref.load %arg1[%112, %113] : memref<8x8xi32, #tpu.memory_space<smem>>
      %c0_i32_93 = arith.constant 0 : i32
      %115 = arith.maxsi %114, %c0_i32_93 : i32
      %c99_i32_94 = arith.constant 99 : i32
      %116 = arith.minsi %115, %c99_i32_94 : i32
      %117 = arith.index_cast %116 : i32 to index
      %c0_95 = arith.constant 0 : index
      %c0_96 = arith.constant 0 : index
      %118 = vector.load %arg2[%117, %c0_95, %c0_96] : memref<100x1x384xf32, #tpu.memory_space<vmem>>, vector<1x1x384xf32>
      %119 = vector.shape_cast %118 : vector<1x1x384xf32> to vector<1x384xf32>
      %120 = arith.addf %arg5, %119 : vector<1x384xf32>
      scf.yield %120 : vector<1x384xf32>
    }
    %c7_i32_4 = arith.constant 7 : i32
    %cst = arith.constant 1.250000e-01 : f32
    %11 = vector.broadcast %cst : f32 to vector<1x384xf32>
    %12 = arith.mulf %10, %11 : vector<1x384xf32>
    %c0_5 = arith.constant 0 : index
    %c0_6 = arith.constant 0 : index
    %13 = vector.load %arg3[%c0_5, %c0_6] : memref<8x384xf32, #tpu.memory_space<vmem>>, vector<1x384xf32>
    tpu.vector_store %arg3[%c0_5, %c0_6], %12 {strides = array<i32>} : memref<8x384xf32, #tpu.memory_space<vmem>>, vector<1x384xf32>,
    %c8_i32_7 = arith.constant 8 : i32
    %14 = arith.muli %arg0, %c8_i32_7 : i32
    %c1_i32_8 = arith.constant 1 : i32
    %15 = arith.addi %14, %c1_i32_8 : i32
    %16 = arith.index_cast %15 : i32 to index
    %c0_9 = arith.constant 0 : index
    %17 = memref.load %arg1[%16, %c0_9] : memref<8x8xi32, #tpu.memory_space<smem>>
    %c0_i32_10 = arith.constant 0 : i32
    %18 = arith.maxsi %17, %c0_i32_10 : i32
    %c99_i32_11 = arith.constant 99 : i32
    %19 = arith.minsi %18, %c99_i32_11 : i32
    %20 = arith.index_cast %19 : i32 to index
    %c0_12 = arith.constant 0 : index
    %c0_13 = arith.constant 0 : index
    %21 = vector.load %arg2[%20, %c0_12, %c0_13] : memref<100x1x384xf32, #tpu.memory_space<vmem>>, vector<1x1x384xf32>
    %22 = vector.shape_cast %21 : vector<1x1x384xf32> to vector<1x384xf32>
    %c1_i32_14 = arith.constant 1 : i32
    %c7_i32_15 = arith.constant 7 : i32
    %23 = arith.addi %c1_i32_14, %c7_i32_15 : i32
    %c1_i32_16 = arith.constant 1 : i32
    %24 = scf.for %arg4 = %c1_i32_14 to %23 step %c1_i32_16 iter_args(%arg5 = %22) -> (vector<1x384xf32>)  : i32 {
      %112 = arith.index_cast %15 : i32 to index
      %113 = arith.index_cast %arg4 : i32 to index
      %114 = memref.load %arg1[%112, %113] : memref<8x8xi32, #tpu.memory_space<smem>>
      %c0_i32_93 = arith.constant 0 : i32
      %115 = arith.maxsi %114, %c0_i32_93 : i32
      %c99_i32_94 = arith.constant 99 : i32
      %116 = arith.minsi %115, %c99_i32_94 : i32
      %117 = arith.index_cast %116 : i32 to index
      %c0_95 = arith.constant 0 : index
      %c0_96 = arith.constant 0 : index
      %118 = vector.load %arg2[%117, %c0_95, %c0_96] : memref<100x1x384xf32, #tpu.memory_space<vmem>>, vector<1x1x384xf32>
      %119 = vector.shape_cast %118 : vector<1x1x384xf32> to vector<1x384xf32>
      %120 = arith.addf %arg5, %119 : vector<1x384xf32>
      scf.yield %120 : vector<1x384xf32>
    }
    %c7_i32_17 = arith.constant 7 : i32
    %cst_18 = arith.constant 1.250000e-01 : f32
    %25 = vector.broadcast %cst_18 : f32 to vector<1x384xf32>
    %26 = arith.mulf %24, %25 : vector<1x384xf32>
    %c1 = arith.constant 1 : index
    %c0_19 = arith.constant 0 : index
    %27 = vector.load %arg3[%c1, %c0_19] : memref<8x384xf32, #tpu.memory_space<vmem>>, vector<1x384xf32>
    tpu.vector_store %arg3[%c1, %c0_19], %26 {strides = array<i32>} : memref<8x384xf32, #tpu.memory_space<vmem>>, vector<1x384xf32>,
    %c8_i32_20 = arith.constant 8 : i32
    %28 = arith.muli %arg0, %c8_i32_20 : i32
    %c2_i32 = arith.constant 2 : i32
    %29 = arith.addi %28, %c2_i32 : i32
    %30 = arith.index_cast %29 : i32 to index
    %c0_21 = arith.constant 0 : index
    %31 = memref.load %arg1[%30, %c0_21] : memref<8x8xi32, #tpu.memory_space<smem>>
    %c0_i32_22 = arith.constant 0 : i32
    %32 = arith.maxsi %31, %c0_i32_22 : i32
    %c99_i32_23 = arith.constant 99 : i32
    %33 = arith.minsi %32, %c99_i32_23 : i32
    %34 = arith.index_cast %33 : i32 to index
    %c0_24 = arith.constant 0 : index
    %c0_25 = arith.constant 0 : index
    %35 = vector.load %arg2[%34, %c0_24, %c0_25] : memref<100x1x384xf32, #tpu.memory_space<vmem>>, vector<1x1x384xf32>
    %36 = vector.shape_cast %35 : vector<1x1x384xf32> to vector<1x384xf32>
    %c1_i32_26 = arith.constant 1 : i32
    %c7_i32_27 = arith.constant 7 : i32
    %37 = arith.addi %c1_i32_26, %c7_i32_27 : i32
    %c1_i32_28 = arith.constant 1 : i32
    %38 = scf.for %arg4 = %c1_i32_26 to %37 step %c1_i32_28 iter_args(%arg5 = %36) -> (vector<1x384xf32>)  : i32 {
      %112 = arith.index_cast %29 : i32 to index
      %113 = arith.index_cast %arg4 : i32 to index
      %114 = memref.load %arg1[%112, %113] : memref<8x8xi32, #tpu.memory_space<smem>>
      %c0_i32_93 = arith.constant 0 : i32
      %115 = arith.maxsi %114, %c0_i32_93 : i32
      %c99_i32_94 = arith.constant 99 : i32
      %116 = arith.minsi %115, %c99_i32_94 : i32
      %117 = arith.index_cast %116 : i32 to index
      %c0_95 = arith.constant 0 : index
      %c0_96 = arith.constant 0 : index
      %118 = vector.load %arg2[%117, %c0_95, %c0_96] : memref<100x1x384xf32, #tpu.memory_space<vmem>>, vector<1x1x384xf32>
      %119 = vector.shape_cast %118 : vector<1x1x384xf32> to vector<1x384xf32>
      %120 = arith.addf %arg5, %119 : vector<1x384xf32>
      scf.yield %120 : vector<1x384xf32>
    }
    %c7_i32_29 = arith.constant 7 : i32
    %cst_30 = arith.constant 1.250000e-01 : f32
    %39 = vector.broadcast %cst_30 : f32 to vector<1x384xf32>
    %40 = arith.mulf %38, %39 : vector<1x384xf32>
    %c2 = arith.constant 2 : index
    %c0_31 = arith.constant 0 : index
    %41 = vector.load %arg3[%c2, %c0_31] : memref<8x384xf32, #tpu.memory_space<vmem>>, vector<1x384xf32>
    tpu.vector_store %arg3[%c2, %c0_31], %40 {strides = array<i32>} : memref<8x384xf32, #tpu.memory_space<vmem>>, vector<1x384xf32>,
    %c8_i32_32 = arith.constant 8 : i32
    %42 = arith.muli %arg0, %c8_i32_32 : i32
    %c3_i32 = arith.constant 3 : i32
    %43 = arith.addi %42, %c3_i32 : i32
    %44 = arith.index_cast %43 : i32 to index
    %c0_33 = arith.constant 0 : index
    %45 = memref.load %arg1[%44, %c0_33] : memref<8x8xi32, #tpu.memory_space<smem>>
    %c0_i32_34 = arith.constant 0 : i32
    %46 = arith.maxsi %45, %c0_i32_34 : i32
    %c99_i32_35 = arith.constant 99 : i32
    %47 = arith.minsi %46, %c99_i32_35 : i32
    %48 = arith.index_cast %47 : i32 to index
    %c0_36 = arith.constant 0 : index
    %c0_37 = arith.constant 0 : index
    %49 = vector.load %arg2[%48, %c0_36, %c0_37] : memref<100x1x384xf32, #tpu.memory_space<vmem>>, vector<1x1x384xf32>
    %50 = vector.shape_cast %49 : vector<1x1x384xf32> to vector<1x384xf32>
    %c1_i32_38 = arith.constant 1 : i32
    %c7_i32_39 = arith.constant 7 : i32
    %51 = arith.addi %c1_i32_38, %c7_i32_39 : i32
    %c1_i32_40 = arith.constant 1 : i32
    %52 = scf.for %arg4 = %c1_i32_38 to %51 step %c1_i32_40 iter_args(%arg5 = %50) -> (vector<1x384xf32>)  : i32 {
      %112 = arith.index_cast %43 : i32 to index
      %113 = arith.index_cast %arg4 : i32 to index
      %114 = memref.load %arg1[%112, %113] : memref<8x8xi32, #tpu.memory_space<smem>>
      %c0_i32_93 = arith.constant 0 : i32
      %115 = arith.maxsi %114, %c0_i32_93 : i32
      %c99_i32_94 = arith.constant 99 : i32
      %116 = arith.minsi %115, %c99_i32_94 : i32
      %117 = arith.index_cast %116 : i32 to index
      %c0_95 = arith.constant 0 : index
      %c0_96 = arith.constant 0 : index
      %118 = vector.load %arg2[%117, %c0_95, %c0_96] : memref<100x1x384xf32, #tpu.memory_space<vmem>>, vector<1x1x384xf32>
      %119 = vector.shape_cast %118 : vector<1x1x384xf32> to vector<1x384xf32>
      %120 = arith.addf %arg5, %119 : vector<1x384xf32>
      scf.yield %120 : vector<1x384xf32>
    }
    %c7_i32_41 = arith.constant 7 : i32
    %cst_42 = arith.constant 1.250000e-01 : f32
    %53 = vector.broadcast %cst_42 : f32 to vector<1x384xf32>
    %54 = arith.mulf %52, %53 : vector<1x384xf32>
    %c3 = arith.constant 3 : index
    %c0_43 = arith.constant 0 : index
    %55 = vector.load %arg3[%c3, %c0_43] : memref<8x384xf32, #tpu.memory_space<vmem>>, vector<1x384xf32>
    tpu.vector_store %arg3[%c3, %c0_43], %54 {strides = array<i32>} : memref<8x384xf32, #tpu.memory_space<vmem>>, vector<1x384xf32>,
    %c8_i32_44 = arith.constant 8 : i32
    %56 = arith.muli %arg0, %c8_i32_44 : i32
    %c4_i32 = arith.constant 4 : i32
    %57 = arith.addi %56, %c4_i32 : i32
    %58 = arith.index_cast %57 : i32 to index
    %c0_45 = arith.constant 0 : index
    %59 = memref.load %arg1[%58, %c0_45] : memref<8x8xi32, #tpu.memory_space<smem>>
    %c0_i32_46 = arith.constant 0 : i32
    %60 = arith.maxsi %59, %c0_i32_46 : i32
    %c99_i32_47 = arith.constant 99 : i32
    %61 = arith.minsi %60, %c99_i32_47 : i32
    %62 = arith.index_cast %61 : i32 to index
    %c0_48 = arith.constant 0 : index
    %c0_49 = arith.constant 0 : index
    %63 = vector.load %arg2[%62, %c0_48, %c0_49] : memref<100x1x384xf32, #tpu.memory_space<vmem>>, vector<1x1x384xf32>
    %64 = vector.shape_cast %63 : vector<1x1x384xf32> to vector<1x384xf32>
    %c1_i32_50 = arith.constant 1 : i32
    %c7_i32_51 = arith.constant 7 : i32
    %65 = arith.addi %c1_i32_50, %c7_i32_51 : i32
    %c1_i32_52 = arith.constant 1 : i32
    %66 = scf.for %arg4 = %c1_i32_50 to %65 step %c1_i32_52 iter_args(%arg5 = %64) -> (vector<1x384xf32>)  : i32 {
      %112 = arith.index_cast %57 : i32 to index
      %113 = arith.index_cast %arg4 : i32 to index
      %114 = memref.load %arg1[%112, %113] : memref<8x8xi32, #tpu.memory_space<smem>>
      %c0_i32_93 = arith.constant 0 : i32
      %115 = arith.maxsi %114, %c0_i32_93 : i32
      %c99_i32_94 = arith.constant 99 : i32
      %116 = arith.minsi %115, %c99_i32_94 : i32
      %117 = arith.index_cast %116 : i32 to index
      %c0_95 = arith.constant 0 : index
      %c0_96 = arith.constant 0 : index
      %118 = vector.load %arg2[%117, %c0_95, %c0_96] : memref<100x1x384xf32, #tpu.memory_space<vmem>>, vector<1x1x384xf32>
      %119 = vector.shape_cast %118 : vector<1x1x384xf32> to vector<1x384xf32>
      %120 = arith.addf %arg5, %119 : vector<1x384xf32>
      scf.yield %120 : vector<1x384xf32>
    }
    %c7_i32_53 = arith.constant 7 : i32
    %cst_54 = arith.constant 1.250000e-01 : f32
    %67 = vector.broadcast %cst_54 : f32 to vector<1x384xf32>
    %68 = arith.mulf %66, %67 : vector<1x384xf32>
    %c4 = arith.constant 4 : index
    %c0_55 = arith.constant 0 : index
    %69 = vector.load %arg3[%c4, %c0_55] : memref<8x384xf32, #tpu.memory_space<vmem>>, vector<1x384xf32>
    tpu.vector_store %arg3[%c4, %c0_55], %68 {strides = array<i32>} : memref<8x384xf32, #tpu.memory_space<vmem>>, vector<1x384xf32>,
    %c8_i32_56 = arith.constant 8 : i32
    %70 = arith.muli %arg0, %c8_i32_56 : i32
    %c5_i32 = arith.constant 5 : i32
    %71 = arith.addi %70, %c5_i32 : i32
    %72 = arith.index_cast %71 : i32 to index
    %c0_57 = arith.constant 0 : index
    %73 = memref.load %arg1[%72, %c0_57] : memref<8x8xi32, #tpu.memory_space<smem>>
    %c0_i32_58 = arith.constant 0 : i32
    %74 = arith.maxsi %73, %c0_i32_58 : i32
    %c99_i32_59 = arith.constant 99 : i32
    %75 = arith.minsi %74, %c99_i32_59 : i32
    %76 = arith.index_cast %75 : i32 to index
    %c0_60 = arith.constant 0 : index
    %c0_61 = arith.constant 0 : index
    %77 = vector.load %arg2[%76, %c0_60, %c0_61] : memref<100x1x384xf32, #tpu.memory_space<vmem>>, vector<1x1x384xf32>
    %78 = vector.shape_cast %77 : vector<1x1x384xf32> to vector<1x384xf32>
    %c1_i32_62 = arith.constant 1 : i32
    %c7_i32_63 = arith.constant 7 : i32
    %79 = arith.addi %c1_i32_62, %c7_i32_63 : i32
    %c1_i32_64 = arith.constant 1 : i32
    %80 = scf.for %arg4 = %c1_i32_62 to %79 step %c1_i32_64 iter_args(%arg5 = %78) -> (vector<1x384xf32>)  : i32 {
      %112 = arith.index_cast %71 : i32 to index
      %113 = arith.index_cast %arg4 : i32 to index
      %114 = memref.load %arg1[%112, %113] : memref<8x8xi32, #tpu.memory_space<smem>>
      %c0_i32_93 = arith.constant 0 : i32
      %115 = arith.maxsi %114, %c0_i32_93 : i32
      %c99_i32_94 = arith.constant 99 : i32
      %116 = arith.minsi %115, %c99_i32_94 : i32
      %117 = arith.index_cast %116 : i32 to index
      %c0_95 = arith.constant 0 : index
      %c0_96 = arith.constant 0 : index
      %118 = vector.load %arg2[%117, %c0_95, %c0_96] : memref<100x1x384xf32, #tpu.memory_space<vmem>>, vector<1x1x384xf32>
      %119 = vector.shape_cast %118 : vector<1x1x384xf32> to vector<1x384xf32>
      %120 = arith.addf %arg5, %119 : vector<1x384xf32>
      scf.yield %120 : vector<1x384xf32>
    }
    %c7_i32_65 = arith.constant 7 : i32
    %cst_66 = arith.constant 1.250000e-01 : f32
    %81 = vector.broadcast %cst_66 : f32 to vector<1x384xf32>
    %82 = arith.mulf %80, %81 : vector<1x384xf32>
    %c5 = arith.constant 5 : index
    %c0_67 = arith.constant 0 : index
    %83 = vector.load %arg3[%c5, %c0_67] : memref<8x384xf32, #tpu.memory_space<vmem>>, vector<1x384xf32>
    tpu.vector_store %arg3[%c5, %c0_67], %82 {strides = array<i32>} : memref<8x384xf32, #tpu.memory_space<vmem>>, vector<1x384xf32>,
    %c8_i32_68 = arith.constant 8 : i32
    %84 = arith.muli %arg0, %c8_i32_68 : i32
    %c6_i32 = arith.constant 6 : i32
    %85 = arith.addi %84, %c6_i32 : i32
    %86 = arith.index_cast %85 : i32 to index
    %c0_69 = arith.constant 0 : index
    %87 = memref.load %arg1[%86, %c0_69] : memref<8x8xi32, #tpu.memory_space<smem>>
    %c0_i32_70 = arith.constant 0 : i32
    %88 = arith.maxsi %87, %c0_i32_70 : i32
    %c99_i32_71 = arith.constant 99 : i32
    %89 = arith.minsi %88, %c99_i32_71 : i32
    %90 = arith.index_cast %89 : i32 to index
    %c0_72 = arith.constant 0 : index
    %c0_73 = arith.constant 0 : index
    %91 = vector.load %arg2[%90, %c0_72, %c0_73] : memref<100x1x384xf32, #tpu.memory_space<vmem>>, vector<1x1x384xf32>
    %92 = vector.shape_cast %91 : vector<1x1x384xf32> to vector<1x384xf32>
    %c1_i32_74 = arith.constant 1 : i32
    %c7_i32_75 = arith.constant 7 : i32
    %93 = arith.addi %c1_i32_74, %c7_i32_75 : i32
    %c1_i32_76 = arith.constant 1 : i32
    %94 = scf.for %arg4 = %c1_i32_74 to %93 step %c1_i32_76 iter_args(%arg5 = %92) -> (vector<1x384xf32>)  : i32 {
      %112 = arith.index_cast %85 : i32 to index
      %113 = arith.index_cast %arg4 : i32 to index
      %114 = memref.load %arg1[%112, %113] : memref<8x8xi32, #tpu.memory_space<smem>>
      %c0_i32_93 = arith.constant 0 : i32
      %115 = arith.maxsi %114, %c0_i32_93 : i32
      %c99_i32_94 = arith.constant 99 : i32
      %116 = arith.minsi %115, %c99_i32_94 : i32
      %117 = arith.index_cast %116 : i32 to index
      %c0_95 = arith.constant 0 : index
      %c0_96 = arith.constant 0 : index
      %118 = vector.load %arg2[%117, %c0_95, %c0_96] : memref<100x1x384xf32, #tpu.memory_space<vmem>>, vector<1x1x384xf32>
      %119 = vector.shape_cast %118 : vector<1x1x384xf32> to vector<1x384xf32>
      %120 = arith.addf %arg5, %119 : vector<1x384xf32>
      scf.yield %120 : vector<1x384xf32>
    }
    %c7_i32_77 = arith.constant 7 : i32
    %cst_78 = arith.constant 1.250000e-01 : f32
    %95 = vector.broadcast %cst_78 : f32 to vector<1x384xf32>
    %96 = arith.mulf %94, %95 : vector<1x384xf32>
    %c6 = arith.constant 6 : index
    %c0_79 = arith.constant 0 : index
    %97 = vector.load %arg3[%c6, %c0_79] : memref<8x384xf32, #tpu.memory_space<vmem>>, vector<1x384xf32>
    tpu.vector_store %arg3[%c6, %c0_79], %96 {strides = array<i32>} : memref<8x384xf32, #tpu.memory_space<vmem>>, vector<1x384xf32>,
    %c8_i32_80 = arith.constant 8 : i32
    %98 = arith.muli %arg0, %c8_i32_80 : i32
    %c7_i32_81 = arith.constant 7 : i32
    %99 = arith.addi %98, %c7_i32_81 : i32
    %100 = arith.index_cast %99 : i32 to index
    %c0_82 = arith.constant 0 : index
    %101 = memref.load %arg1[%100, %c0_82] : memref<8x8xi32, #tpu.memory_space<smem>>
    %c0_i32_83 = arith.constant 0 : i32
    %102 = arith.maxsi %101, %c0_i32_83 : i32
    %c99_i32_84 = arith.constant 99 : i32
    %103 = arith.minsi %102, %c99_i32_84 : i32
    %104 = arith.index_cast %103 : i32 to index
    %c0_85 = arith.constant 0 : index
    %c0_86 = arith.constant 0 : index
    %105 = vector.load %arg2[%104, %c0_85, %c0_86] : memref<100x1x384xf32, #tpu.memory_space<vmem>>, vector<1x1x384xf32>
    %106 = vector.shape_cast %105 : vector<1x1x384xf32> to vector<1x384xf32>
    %c1_i32_87 = arith.constant 1 : i32
    %c7_i32_88 = arith.constant 7 : i32
    %107 = arith.addi %c1_i32_87, %c7_i32_88 : i32
    %c1_i32_89 = arith.constant 1 : i32
    %108 = scf.for %arg4 = %c1_i32_87 to %107 step %c1_i32_89 iter_args(%arg5 = %106) -> (vector<1x384xf32>)  : i32 {
      %112 = arith.index_cast %99 : i32 to index
      %113 = arith.index_cast %arg4 : i32 to index
      %114 = memref.load %arg1[%112, %113] : memref<8x8xi32, #tpu.memory_space<smem>>
      %c0_i32_93 = arith.constant 0 : i32
      %115 = arith.maxsi %114, %c0_i32_93 : i32
      %c99_i32_94 = arith.constant 99 : i32
      %116 = arith.minsi %115, %c99_i32_94 : i32
      %117 = arith.index_cast %116 : i32 to index
      %c0_95 = arith.constant 0 : index
      %c0_96 = arith.constant 0 : index
      %118 = vector.load %arg2[%117, %c0_95, %c0_96] : memref<100x1x384xf32, #tpu.memory_space<vmem>>, vector<1x1x384xf32>
      %119 = vector.shape_cast %118 : vector<1x1x384xf32> to vector<1x384xf32>
      %120 = arith.addf %arg5, %119 : vector<1x384xf32>
      scf.yield %120 : vector<1x384xf32>
    }
    %c7_i32_90 = arith.constant 7 : i32
    %cst_91 = arith.constant 1.250000e-01 : f32
    %109 = vector.broadcast %cst_91 : f32 to vector<1x384xf32>
    %110 = arith.mulf %108, %109 : vector<1x384xf32>
    %c7 = arith.constant 7 : index
    %c0_92 = arith.constant 0 : index
    %111 = vector.load %arg3[%c7, %c0_92] : memref<8x384xf32, #tpu.memory_space<vmem>>, vector<1x384xf32>
    tpu.vector_store %arg3[%c7, %c0_92], %110 {strides = array<i32>} : memref<8x384xf32, #tpu.memory_space<vmem>>, vector<1x384xf32>,
    return
  }
  func.func @transform_0(%arg0: i32, %arg1: memref<8x8xi32, #tpu.memory_space<smem>>) -> (i32, i32, i32) {
    %c0_i32 = arith.constant 0 : i32
    %c0_i32_0 = arith.constant 0 : i32
    %c0_i32_1 = arith.constant 0 : i32
    %c0_i32_2 = arith.constant 0 : i32
    return %c0_i32, %c0_i32_0, %c0_i32_1 : i32, i32, i32
  }
  func.func @transform_1(%arg0: i32, %arg1: memref<8x8xi32, #tpu.memory_space<smem>>) -> (i32, i32) {
    %c0_i32 = arith.constant 0 : i32
    %c0_i32_0 = arith.constant 0 : i32
    return %arg0, %c0_i32 : i32, i32
  }
}

</mosaic_0001>

<bundles_post_ra>
// kernel: awe_forward.1
= control target key start
LH: loop header
LB: loop body
LE: loop exit
PB: predicated region body
PF: predicated region fallthrough
CT: control target
= control target key end

     0   :  { %s942_s0 = inlined_call_operand.vmem [shape: s32[8,8], index: 0, kind: input, shape index: {}]   ;;  %s943_s1 = inlined_call_operand.hbm [shape: f32[100,1,384], index: 1, kind: input, shape index: {}]   ;;  %s944_s2 = inlined_call_operand.vmem [shape: f32[8,384], index: 2, kind: output, shape index: {}]  }
   0x1   :  { %s7_s11 = sshll.u32 %s942_s0, 4  ;;  %s8_s11 = int_to_ptr.vmem [resolvable:$true] %s7_s11 }
   0x2   :  { %s709_s12 = scalar_lea.vmem %s8_s11, 128  ;;  %p714_p1 = scmp.lt.s32.totalorder %s8_s11, %s8_s11 }
   0x3   :  { %p710_p0 = scmp.ne.s32.totalorder %s8_s11, %s709_s12  ;;  %p715_p2 = scmp.lt.s32.totalorder %s709_s12, %s709_s12 }
   0x5   :  { %p716_p3 = por %p715_p2, %p714_p1 }
   0x7   :  { %p717_p4 = pnand %p716_p3, %p710_p0 }
   0x9   :  { %720 = shalt.err (!%p717_p4)  }
   0xa   :  { %s873_s13 = smov [#allocation3]  }
   0xb   :  { %10 = dma.vmem_to_smem %s8_s11, 128, %s873_s13, [#allocation2] }
   0xc   :  { %805 = dma.done.wait [#allocation2], 128 }
   0xd   :  { %806 = vsyncadd [#allocation2], 4294967168 }
   0xe   :  { %12 = sfence }
   0xf   :  { %13 = vsyncpa [#allocation5], 0  ;;  %s874_s14 = smov [#allocation4]  }
  0x10   :  { %s19_s15 = sshll.u32 %s874_s14, 4  ;;  %s20_s15 = int_to_ptr.vmem [resolvable:$true] %s19_s15 }
  0x11   :  { %s729_s16 = scalar_lea.vmem %s20_s15, 4800  ;;  %p734_p6 = scmp.lt.s32.totalorder %s20_s15, %s20_s15 }
  0x12   :  { %p730_p5 = scmp.ne.s32.totalorder %s20_s15, %s729_s16  ;;  %p735_p7 = scmp.lt.s32.totalorder %s729_s16, %s729_s16 }
  0x14   :  { %p736_p8 = por %p735_p7, %p734_p6 }
  0x16   :  { %p737_p9 = pnand %p736_p8, %p730_p5 }
  0x18   :  { %740 = shalt.err (!%p737_p9)
}
  0x19   :  { %s875_s0 = smov 48   ;;  %s876_s17 = smov 3  }
  0x1a   :  { %25 = dma.hbm_to_vmem [thread:$0]  %s943_s1, 4800, %s20_s15, [#allocation5], %s875_s0, %s875_s0, %s876_s17  }
  0x1b   :  { %807 = dma.done.wait [#allocation5], 4800  }
  0x1c   :  { %808 = vsyncadd [#allocation5], 4294962496  ;;  %s31_s20 = sld [smem:[#allocation3]]  ;;  %s813_s23 = smov 1  }
  0x22   :  { %p32_p10 = scmp.gt.s32.totalorder %s31_s20, 0  ;;  %p429_p11 = scmp.lt.s32.totalorder %s31_s20, 99 }
  0x24   :  { %s948_s20 = smov (!%p32_p10, %s31_s20), 0 }
  0x25   :  { %s950_s20 = smov (!%p429_p11, %s948_s20), 99 }
  0x26   :  { %s36_s21 = smul.u32 3, %s950_s20 }
  0x28   :  { %s37_s22 = scalar_lea.vmem [#allocation4], %s36_s21 }
  0x29   :  { %v38_v0 = vld [vmem:[%s37_s22] sm:$0x7]  }
  0x2a   :  { %v809_v1 = vmov %v38_v0  }
  0x2b LB: > { %s46_s24 = sshra.s32 %s815_s23, 7  ;;  %s51_s25 = sand.u32 127, %s815_s23  ;;  %s815_s23 = sphi %s813_s23, %s44_s23   ;;  %v811_v1 = vphi %v809_v1, %v810_v1  }
  0x2c   : > { %s434_s26 = sshll.u32 %s46_s24, 7  ;;  %s44_s23 = sadd.s32 1, %s815_s23  }
  0x2d   : > { %s52_s1 = sadd.s32 %s434_s26, %s51_s25  ;;  %p41_p0 = scmp.ge.s32.totalorder %s44_s23, 8  }
  0x2e   : > { %s53_s27 = sld [smem:[#allocation3 + %s52_s1]]  ;;  %v63_v5 = vlaneseq (%p41_p0)  ;;  %s821_s7 = smov (%p41_p0), 1  }
  0x2f   :  { %s440_s30 = sld [smem:[#allocation3 + $0x80]] (%p41_p0) }
  0x30   :  { %vm898_vm0 = vcmp.lt.s32.totalorder (%p41_p0), %v63_v5, 384 }
  0x34   : > { %p54_p12 = scmp.gt.s32.totalorder %s53_s27, 0  ;;  %p435_p13 = scmp.lt.s32.totalorder %s53_s27, 99 }
  0x35   :  { %p72_p1 = scmp.gt.s32.totalorder (%p41_p0), %s440_s30, 0  ;;  %p441_p2 = scmp.lt.s32.totalorder (%p41_p0), %s440_s30, 99 }
  0x36   : > { %s952_s27 = smov (!%p54_p12, %s53_s27), 0 }
  0x37   : > { %s954_s27 = smov (!%p435_p13, %s952_s27), 99 }
  0x38   : > { %s58_s28 = smul.u32 3, %s954_s27 }
  0x3a   : > { %s59_s29 = scalar_lea.vmem [#allocation4], %s58_s28  ;;  %43 = sbr.rel (!%p41_p0) target bundleno = 43 (0x2b), region = 107 }
  0x3b   : > { %v60_v2 = vld [vmem:[%s59_s29] sm:$0x7] }
  0x3c   : > { %v61_v3 = vadd.f32 %v811_v1, %v60_v2  }
  0x3e   : > { %v810_v1 = vmov %v61_v3   ;;  %v62_v4 = vmul.f32 (%p41_p0), 0.125, %v61_v3 }
  0x3f   :  { %s956_s30 = smov (!%p72_p1, %s440_s30), 0 }
  0x40   :  { %67 = vst.msk [vmem:[%s944_s2] ss:$8 sm:$0x7] %vm898_vm0, %v62_v4  ;;  %s958_s30 = smov (!%p441_p2, %s956_s30), 99 }
  0x41   :  { %s76_s5 = smul.u32 3, %s958_s30 }
  0x43   :  { %s77_s6 = scalar_lea.vmem [#allocation4], %s76_s5 }
  0x44   :  { %v78_v7 = vld [vmem:[%s77_s6] sm:$0x7]  }
  0x45   :  { %v817_v8 = vmov %v78_v7  }
  0x46 LB: > { %s86_s8 = sshra.s32 %s823_s7, 7  ;;  %s91_s9 = sand.u32 127, %s823_s7  ;;  %s823_s7 = sphi %s821_s7, %s84_s7   ;;  %v819_v8 = vphi %v817_v8, %v818_v8  }
  0x47   : > { %s537_s10 = sshll.u32 %s86_s8, 7  ;;  %s84_s7 = sadd.s32 1, %s823_s7  }
  0x48   : > { %s538_s11 = sadd.s32 128, %s537_s10  ;;  %p81_p5 = scmp.ge.s32.totalorder %s84_s7, 8  }
  0x49   : > { %s92_s12 = sadd.s32 %s538_s11, %s91_s9  ;;  %s453_s16 = sld [smem:[#allocation3 + $0x100]] (%p81_p5) }
  0x4a   : > { %s93_s13 = sld [smem:[#allocation3 + %s92_s12]]  ;;  %s829_s20 = smov (%p81_p5), 1  }
  0x4f   :  { %p109_p6 = scmp.gt.s32.totalorder (%p81_p5), %s453_s16, 0  ;;  %p454_p7 = scmp.lt.s32.totalorder (%p81_p5), %s453_s16, 99 }
  0x50   : > { %p94_p3 = scmp.gt.s32.totalorder %s93_s13, 0  ;;  %p447_p4 = scmp.lt.s32.totalorder %s93_s13, 99 }
  0x52   : > { %s960_s13 = smov (!%p94_p3, %s93_s13), 0 }
  0x53   : > { %s962_s13 = smov (!%p447_p4, %s960_s13), 99 }
  0x54   : > { %s98_s14 = smul.u32 3, %s962_s13 }
  0x56   : > { %s99_s15 = scalar_lea.vmem [#allocation4], %s98_s14  ;;  %83 = sbr.rel (!%p81_p5) target bundleno = 70 (0x46), region = 118 }
  0x57   : > { %v100_v9 = vld [vmem:[%s99_s15] sm:$0x7] }
  0x58   : > { %v101_v10 = vadd.f32 %v819_v8, %v100_v9  }
  0x5a   : > { %v818_v8 = vmov %v101_v10   ;;  %v102_v11 = vmul.f32 (%p81_p5), 0.125, %v101_v10 }
  0x5b   :  { %s964_s16 = smov (!%p109_p6, %s453_s16), 0 }
  0x5c   :  { %452 = vst.msk [vmem:[%s944_s2 + $0x1] ss:$8 sm:$0x7] %vm898_vm0, %v102_v11  ;;  %s966_s16 = smov (!%p454_p7, %s964_s16), 99 }
  0x5d   :  { %s113_s18 = smul.u32 3, %s966_s16 }
  0x5f   :  { %s114_s19 = scalar_lea.vmem [#allocation4], %s113_s18 }
  0x60   :  { %v115_v12 = vld [vmem:[%s114_s19] sm:$0x7]  }
  0x61   :  { %v825_v13 = vmov %v115_v12  }
  0x62 LB: > { %s123_s21 = sshra.s32 %s831_s20, 7  ;;  %s128_s22 = sand.u32 127, %s831_s20  ;;  %s831_s20 = sphi %s829_s20, %s121_s20   ;;  %v827_v13 = vphi %v825_v13, %v826_v13  }
  0x63   : > { %s543_s23 = sshll.u32 %s123_s21, 7  ;;  %s121_s20 = sadd.s32 1, %s831_s20  }
  0x64   : > { %s544_s24 = sadd.s32 256, %s543_s23  ;;  %p118_p10 = scmp.ge.s32.totalorder %s121_s20, 8  }
  0x65   : > { %s129_s25 = sadd.s32 %s544_s24, %s128_s22  ;;  %s466_s28 = sld [smem:[#allocation3 + $0x180]] (%p118_p10) }
  0x66   : > { %s130_s26 = sld [smem:[#allocation3 + %s129_s25]]  ;;  %s837_s5 = smov (%p118_p10), 1  }
  0x6b   :  { %p146_p11 = scmp.gt.s32.totalorder (%p118_p10), %s466_s28, 0  ;;  %p467_p12 = scmp.lt.s32.totalorder (%p118_p10), %s466_s28, 99 }
  0x6c   : > { %p131_p8 = scmp.gt.s32.totalorder %s130_s26, 0  ;;  %p460_p9 = scmp.lt.s32.totalorder %s130_s26, 99 }
  0x6e   : > { %s968_s26 = smov (!%p131_p8, %s130_s26), 0 }
  0x6f   : > { %s970_s26 = smov (!%p460_p9, %s968_s26), 99 }
  0x70   : > { %s135_s1 = smul.u32 3, %s970_s26 }
  0x72   : > { %s136_s27 = scalar_lea.vmem [#allocation4], %s135_s1  ;;  %120 = sbr.rel (!%p118_p10) target bundleno = 98 (0x62), region = 129 }
  0x73   : > { %v137_v14 = vld [vmem:[%s136_s27] sm:$0x7] }
  0x74   : > { %v138_v15 = vadd.f32 %v827_v13, %v137_v14  }
  0x76   : > { %v826_v13 = vmov %v138_v15   ;;  %v139_v16 = vmul.f32 (%p118_p10), 0.125, %v138_v15 }
  0x77   :  { %s972_s28 = smov (!%p146_p11, %s466_s28), 0 }
  0x78   :  { %465 = vst.msk [vmem:[%s944_s2 + $0x2] ss:$8 sm:$0x7] %vm898_vm0, %v139_v16  ;;  %s974_s28 = smov (!%p467_p12, %s972_s28), 99 }
  0x79   :  { %s150_s3 = smul.u32 3, %s974_s28 }
  0x7b   :  { %s151_s4 = scalar_lea.vmem [#allocation4], %s150_s3 }
  0x7c   :  { %v152_v17 = vld [vmem:[%s151_s4] sm:$0x7]  }
  0x7d   :  { %v833_v18 = vmov %v152_v17  }
  0x7e LB: > { %s160_s6 = sshra.s32 %s839_s5, 7  ;;  %s165_s7 = sand.u32 127, %s839_s5  ;;  %s839_s5 = sphi %s837_s5, %s158_s5   ;;  %v835_v18 = vphi %v833_v18, %v834_v18  }
  0x7f   : > { %s549_s8 = sshll.u32 %s160_s6, 7  ;;  %s158_s5 = sadd.s32 1, %s839_s5  }
  0x80   : > { %s550_s9 = sadd.s32 384, %s549_s8  ;;  %p155_p1 = scmp.ge.s32.totalorder %s158_s5, 8  }
  0x81   : > { %s166_s10 = sadd.s32 %s550_s9, %s165_s7  ;;  %s479_s14 = sld [smem:[#allocation3 + $0x200]] (%p155_p1) }
  0x82   : > { %s167_s11 = sld [smem:[#allocation3 + %s166_s10]]  ;;  %s845_s18 = smov (%p155_p1), 1  }
  0x87   :  { %p183_p2 = scmp.gt.s32.totalorder (%p155_p1), %s479_s14, 0  ;;  %p480_p3 = scmp.lt.s32.totalorder (%p155_p1), %s479_s14, 99 }
  0x88   : > { %p168_p13 = scmp.gt.s32.totalorder %s167_s11, 0  ;;  %p473_p0 = scmp.lt.s32.totalorder %s167_s11, 99 }
  0x8a   : > { %s976_s11 = smov (!%p168_p13, %s167_s11), 0 }
  0x8b   : > { %s978_s11 = smov (!%p473_p0, %s976_s11), 99 }
  0x8c   : > { %s172_s12 = smul.u32 3, %s978_s11 }
  0x8e   : > { %s173_s13 = scalar_lea.vmem [#allocation4], %s172_s12  ;;  %157 = sbr.rel (!%p155_p1) target bundleno = 126 (0x7e), region = 140 }
  0x8f   : > { %v174_v19 = vld [vmem:[%s173_s13] sm:$0x7] }
  0x90   : > { %v175_v20 = vadd.f32 %v835_v18, %v174_v19  }
  0x92   : > { %v834_v18 = vmov %v175_v20   ;;  %v176_v21 = vmul.f32 (%p155_p1), 0.125, %v175_v20 }
  0x93   :  { %s980_s14 = smov (!%p183_p2, %s479_s14), 0 }
  0x94   :  { %478 = vst.msk [vmem:[%s944_s2 + $0x3] ss:$8 sm:$0x7] %vm898_vm0, %v176_v21  ;;  %s982_s14 = smov (!%p480_p3, %s980_s14), 99 }
  0x95   :  { %s187_s0 = smul.u32 3, %s982_s14 }
  0x97   :  { %s188_s17 = scalar_lea.vmem [#allocation4], %s187_s0 }
  0x98   :  { %v189_v22 = vld [vmem:[%s188_s17] sm:$0x7]  }
  0x99   :  { %v841_v23 = vmov %v189_v22  }
  0x9a LB: > { %s197_s19 = sshra.s32 %s847_s18, 7  ;;  %s202_s20 = sand.u32 127, %s847_s18  ;;  %s847_s18 = sphi %s845_s18, %s195_s18   ;;  %v843_v23 = vphi %v841_v23, %v842_v23  }
  0x9b   : > { %s555_s21 = sshll.u32 %s197_s19, 7  ;;  %s195_s18 = sadd.s32 1, %s847_s18  }
  0x9c   : > { %s556_s22 = sadd.s32 512, %s555_s21  ;;  %p192_p6 = scmp.ge.s32.totalorder %s195_s18, 8  }
  0x9d   : > { %s203_s23 = sadd.s32 %s556_s22, %s202_s20  ;;  %s492_s1 = sld [smem:[#allocation3 + $0x280]] (%p192_p6) }
  0x9e   : > { %s204_s24 = sld [smem:[#allocation3 + %s203_s23]]  ;;  %s853_s3 = smov (%p192_p6), 1  }
  0xa3   :  { %p220_p7 = scmp.gt.s32.totalorder (%p192_p6), %s492_s1, 0  ;;  %p493_p8 = scmp.lt.s32.totalorder (%p192_p6), %s492_s1, 99 }
  0xa4   : > { %p205_p4 = scmp.gt.s32.totalorder %s204_s24, 0  ;;  %p486_p5 = scmp.lt.s32.totalorder %s204_s24, 99 }
  0xa6   : > { %s984_s24 = smov (!%p205_p4, %s204_s24), 0 }
  0xa7   : > { %s986_s24 = smov (!%p486_p5, %s984_s24), 99 }
  0xa8   : > { %s209_s25 = smul.u32 3, %s986_s24 }
  0xaa   : > { %s210_s26 = scalar_lea.vmem [#allocation4], %s209_s25  ;;  %194 = sbr.rel (!%p192_p6) target bundleno = 154 (0x9a), region = 151 }
  0xab   : > { %v211_v24 = vld [vmem:[%s210_s26] sm:$0x7] }
  0xac   : > { %v212_v25 = vadd.f32 %v843_v23, %v211_v24  }
  0xae   : > { %v842_v23 = vmov %v212_v25   ;;  %v213_v26 = vmul.f32 (%p192_p6), 0.125, %v212_v25 }
  0xaf   :  { %s988_s1 = smov (!%p220_p7, %s492_s1), 0 }
  0xb0   :  { %491 = vst.msk [vmem:[%s944_s2 + $0x4] ss:$8 sm:$0x7] %vm898_vm0, %v213_v26  ;;  %s990_s1 = smov (!%p493_p8, %s988_s1), 99 }
  0xb1   :  { %s224_s29 = smul.u32 3, %s990_s1 }
  0xb3   :  { %s225_s30 = scalar_lea.vmem [#allocation4], %s224_s29 }
  0xb4   :  { %v226_v27 = vld [vmem:[%s225_s30] sm:$0x7]  }
  0xb5   :  { %v849_v28 = vmov %v226_v27  }
  0xb6 LB: > { %s234_s4 = sshra.s32 %s855_s3, 7  ;;  %s239_s5 = sand.u32 127, %s855_s3  ;;  %s855_s3 = sphi %s853_s3, %s232_s3   ;;  %v851_v28 = vphi %v849_v28, %v850_v28  }
  0xb7   : > { %s561_s6 = sshll.u32 %s234_s4, 7  ;;  %s232_s3 = sadd.s32 1, %s855_s3  }
  0xb8   : > { %s562_s7 = sadd.s32 640, %s561_s6  ;;  %p229_p11 = scmp.ge.s32.totalorder %s232_s3, 8  }
  0xb9   : > { %s240_s8 = sadd.s32 %s562_s7, %s239_s5  ;;  %s505_s12 = sld [smem:[#allocation3 + $0x300]] (%p229_p11) }
  0xba   : > { %s241_s9 = sld [smem:[#allocation3 + %s240_s8]]  ;;  %s861_s0 = smov (%p229_p11), 1  }
  0xbf   :  { %p257_p12 = scmp.gt.s32.totalorder (%p229_p11), %s505_s12, 0  ;;  %p506_p13 = scmp.lt.s32.totalorder (%p229_p11), %s505_s12, 99 }
  0xc0   : > { %p242_p9 = scmp.gt.s32.totalorder %s241_s9, 0  ;;  %p499_p10 = scmp.lt.s32.totalorder %s241_s9, 99 }
  0xc2   : > { %s992_s9 = smov (!%p242_p9, %s241_s9), 0 }
  0xc3   : > { %s994_s9 = smov (!%p499_p10, %s992_s9), 99 }
  0xc4   : > { %s246_s10 = smul.u32 3, %s994_s9 }
  0xc6   : > { %s247_s11 = scalar_lea.vmem [#allocation4], %s246_s10  ;;  %231 = sbr.rel (!%p229_p11) target bundleno = 182 (0xb6), region = 162 }
  0xc7   : > { %v248_v29 = vld [vmem:[%s247_s11] sm:$0x7] }
  0xc8   : > { %v249_v30 = vadd.f32 %v851_v28, %v248_v29  }
  0xca   : > { %v850_v28 = vmov %v249_v30   ;;  %v250_v31 = vmul.f32 (%p229_p11), 0.125, %v249_v30 }
  0xcb   :  { %s996_s12 = smov (!%p257_p12, %s505_s12), 0 }
  0xcc   :  { %504 = vst.msk [vmem:[%s944_s2 + $0x5] ss:$8 sm:$0x7] %vm898_vm0, %v250_v31  ;;  %s998_s12 = smov (!%p506_p13, %s996_s12), 99 }
  0xcd   :  { %s261_s15 = smul.u32 3, %s998_s12 }
  0xcf   :  { %s262_s16 = scalar_lea.vmem [#allocation4], %s261_s15 }
  0xd0   :  { %v263_v32 = vld [vmem:[%s262_s16] sm:$0x7]  }
  0xd1   :  { %v857_v33 = vmov %v263_v32  }
  0xd2 LB: > { %s271_s17 = sshra.s32 %s863_s0, 7  ;;  %s276_s18 = sand.u32 127, %s863_s0  ;;  %s863_s0 = sphi %s861_s0, %s269_s0   ;;  %v859_v33 = vphi %v857_v33, %v858_v33  }
  0xd3   : > { %s567_s19 = sshll.u32 %s271_s17, 7  ;;  %s269_s0 = sadd.s32 1, %s863_s0  }
  0xd4   : > { %s568_s20 = sadd.s32 768, %s567_s19  ;;  %p266_p2 = scmp.ge.s32.totalorder %s269_s0, 8  }
  0xd5   : > { %s277_s21 = sadd.s32 %s568_s20, %s276_s18  ;;  %s518_s25 = sld [smem:[#allocation3 + $0x380]] (%p266_p2) }
  0xd6   : > { %s278_s22 = sld [smem:[#allocation3 + %s277_s21]]  ;;  %s869_s29 = smov (%p266_p2), 1  }
  0xdb   :  { %p294_p3 = scmp.gt.s32.totalorder (%p266_p2), %s518_s25, 0  ;;  %p519_p4 = scmp.lt.s32.totalorder (%p266_p2), %s518_s25, 99 }
  0xdc   : > { %p279_p0 = scmp.gt.s32.totalorder %s278_s22, 0  ;;  %p512_p1 = scmp.lt.s32.totalorder %s278_s22, 99 }
  0xde   : > { %s1000_s22 = smov (!%p279_p0, %s278_s22), 0 }
  0xdf   : > { %s1002_s22 = smov (!%p512_p1, %s1000_s22), 99 }
  0xe0   : > { %s283_s23 = smul.u32 3, %s1002_s22 }
  0xe2   : > { %s284_s24 = scalar_lea.vmem [#allocation4], %s283_s23  ;;  %268 = sbr.rel (!%p266_p2) target bundleno = 210 (0xd2), region = 173 }
  0xe3   : > { %v285_v34 = vld [vmem:[%s284_s24] sm:$0x7] }
  0xe4   : > { %v286_v35 = vadd.f32 %v859_v33, %v285_v34  }
  0xe6   : > { %v858_v33 = vmov %v286_v35   ;;  %v287_v36 = vmul.f32 (%p266_p2), 0.125, %v286_v35 }
  0xe7   :  { %s1004_s25 = smov (!%p294_p3, %s518_s25), 0 }
  0xe8   :  { %517 = vst.msk [vmem:[%s944_s2 + $0x6] ss:$8 sm:$0x7] %vm898_vm0, %v287_v36  ;;  %s1006_s25 = smov (!%p519_p4, %s1004_s25), 99 }
  0xe9   :  { %s298_s27 = smul.u32 3, %s1006_s25 }
  0xeb   :  { %s299_s28 = scalar_lea.vmem [#allocation4], %s298_s27 }
  0xec   :  { %v300_v37 = vld [vmem:[%s299_s28] sm:$0x7]  }
  0xed   :  { %v865_v38 = vmov %v300_v37  }
  0xee LB: > { %s308_s30 = sshra.s32 %s871_s29, 7  ;;  %s313_s3 = sand.u32 127, %s871_s29  ;;  %s871_s29 = sphi %s869_s29, %s306_s29   ;;  %v867_v38 = vphi %v865_v38, %v866_v38  }
  0xef   : > { %s573_s4 = sshll.u32 %s308_s30, 7  ;;  %s306_s29 = sadd.s32 1, %s871_s29  }
  0xf0   : > { %s574_s5 = sadd.s32 896, %s573_s4  ;;  %p303_p7 = scmp.ge.s32.totalorder %s306_s29, 8  }
  0xf1   : > { %s314_s6 = sadd.s32 %s574_s5, %s313_s3 }
  0xf2   : > { %s315_s7 = sld [smem:[#allocation3 + %s314_s6]] }
  0xf8   : > { %p316_p5 = scmp.gt.s32.totalorder %s315_s7, 0  ;;  %p525_p6 = scmp.lt.s32.totalorder %s315_s7, 99 }
  0xfa   : > { %s1008_s7 = smov (!%p316_p5, %s315_s7), 0 }
  0xfb   : > { %s1010_s7 = smov (!%p525_p6, %s1008_s7), 99 }
  0xfc   : > { %s320_s8 = smul.u32 3, %s1010_s7 }
  0xfe   : > { %s321_s9 = scalar_lea.vmem [#allocation4], %s320_s8  ;;  %305 = sbr.rel (!%p303_p7) target bundleno = 238 (0xee), region = 184 }
  0xff   : > { %v322_v39 = vld [vmem:[%s321_s9] sm:$0x7] }
 0x100   : > { %v323_v40 = vadd.f32 %v867_v38, %v322_v39  }
 0x102   : > { %v866_v38 = vmov %v323_v40   ;;  %v324_v41 = vmul.f32 (%p303_p7), 0.125, %v323_v40 }
 0x104   :  { %530 = vst.msk [vmem:[%s944_s2 + $0x7] ss:$8 sm:$0x7] %vm898_vm0, %v324_v41 }
 0x105   :  { %332 = vsyncpa [#allocation5], 1 }

</bundles_post_ra>
